<compile_context>
chip_gen: v7x
topology: tpu7x:2x2x1
jax: 0.10.0
libtpu: 0.0.40
codegen_flags: <defaults>
</compile_context>

<pallas_src>
import math

import jax
import jax.numpy as jnp
from jax.experimental import pallas as pl
from jax.experimental.pallas import tpu as pltpu


def _build_pe(d_model: int, max_len: int) -> jnp.ndarray:
    """Deterministic sinusoidal table, identical to the PyTorch __init__."""
    position = jnp.arange(0, max_len, dtype=jnp.float32)[:, None]            # (max_len, 1)
    div_term = jnp.exp(
        jnp.arange(0, d_model, 2, dtype=jnp.float32) * (-math.log(10000.0) / d_model)
    )                                                                         # (d_model/2,)
    pe = jnp.zeros((max_len, d_model), dtype=jnp.float32)
    pe = pe.at[:, 0::2].set(jnp.sin(position * div_term))
    pe = pe.at[:, 1::2].set(jnp.cos(position * div_term))
    # unsqueeze(0).transpose(0, 1) -> (max_len, 1, d_model)
    return pe[:, None, :]


# ----------------------------------------------------------------------------- budgets
def _vmem_budget_and_limit():
    """Generation-aware VMEM budget for the double-buffered block footprint."""
    cap = None
    try:
        cap = getattr(pltpu.get_tpu_info(), "vmem_capacity_bytes", None)
    except Exception:
        cap = None
    if not cap or cap <= 0:
        cap = 64 * 1024 * 1024          # conservative fallback (v7x per-TC capacity)
    cap = int(cap)
    budget = cap // 3                    # ~33% of capacity for the pipelined blocks
    limit = min(cap - (8 << 20), budget + (8 << 20))   # scoped limit: budget + headroom
    limit = max(limit, 16 << 20)
    return budget, int(limit)


# ----------------------------------------------------------------------------- kernels
def _add3d_kernel(x_ref, pe_ref, fe_ref, o_ref):
    # pe block is (tile_s, 1, d_model): the batch broadcast happens in VMEM on the VPU,
    # so pe contributes only tile_s * d_model bytes of HBM traffic per step.
    o_ref[...] = x_ref[...] + pe_ref[...] + fe_ref[...]


def _make_add2d_kernel(reps: int):
    def kernel(x_ref, pe_ref, fe_ref, o_ref):
        pe_tile = pe_ref[...]                          # (tile_s, d_model), un-broadcast
        if reps > 1:
            # The (seq, batch, d_model) -> (seq, batch*d_model) flattening puts `reps`
            # contiguous copies of d_model along the lane axis, so an in-VMEM lane tile
            # reproduces the batch broadcast exactly (XLU/VPU slots have huge slack here).
            pe_tile = jnp.tile(pe_tile, (1, reps))
        o_ref[...] = x_ref[...] + pe_tile + fe_ref[...]
    return kernel


# ----------------------------------------------------------------------------- 3-D path
def _forward_3d(x, fe, pe_slice, budget, limit):
    """Aligned case: batch % sublane == 0 and d_model % 128 == 0. pe stays (seq,1,d_model)."""
    seq, batch, d_model = x.shape
    itemsize = jnp.dtype(x.dtype).itemsize
    # double-buffered bytes per seq row: x + fe + out + pe (pe is only d_model wide)
    per_row = 2 * itemsize * (3 * batch * d_model + d_model)
    max_rows = budget // per_row
    if max_rows < 1:
        return None                                   # a single row doesn't fit -> flattened path

    # >= 2 grid steps whenever seq allows it: pipelining + v7x 2-TC sharding.
    n_steps = max(min(seq, 2), pl.cdiv(seq, max_rows))
    tile_s = pl.cdiv(seq, n_steps)
    grid = (pl.cdiv(seq, tile_s),)

    return pl.pallas_call(
        _add3d_kernel,
        out_shape=jax.ShapeDtypeStruct((seq, batch, d_model), x.dtype),
        grid_spec=pltpu.PrefetchScalarGridSpec(
            num_scalar_prefetch=0,
            grid=grid,
            in_specs=[
                pl.BlockSpec((tile_s, batch, d_model), lambda i: (i, 0, 0)),
                pl.BlockSpec((tile_s, 1, d_model), lambda i: (i, 0, 0)),
                pl.BlockSpec((tile_s, batch, d_model), lambda i: (i, 0, 0)),
            ],
            out_specs=pl.BlockSpec((tile_s, batch, d_model), lambda i: (i, 0, 0)),
        ),
        compiler_params=pltpu.CompilerParams(
            dimension_semantics=("parallel",),
            vmem_limit_bytes=limit,
        ),
    )(x, pe_slice, fe)


# ----------------------------------------------------------------------------- 2-D path
def _forward_2d(x, fe, pe_slice, budget, limit):
    """General case: flatten to (seq, batch*d_model) for full sublane/lane density."""
    seq, batch, d_model = x.shape
    itemsize = jnp.dtype(x.dtype).itemsize
    lanes = batch * d_model
    row_align = (8 * 4) // itemsize                   # dtype-aware sublane granule (f32:8, bf16:16, int8:32)
    k_unit = 128 // math.gcd(d_model, 128)            # batch members per 128-lane-aligned granule

    def fits(ts, k):
        # x, fe, out blocks of (ts, k*d_model) + pe block of (ts, d_model), double-buffered.
        return 2 * itemsize * ts * (3 * k * d_model + d_model) <= budget

    # ---- lane tiling (second grid axis): needed when a single flattened row is too wide for
    #      the budget, or to create grid steps when seq is too short to split.
    k = batch
    min_rows = min(seq, row_align)
    need_lane_split = not fits(min_rows, batch)
    want_lane_steps = (seq < 2 * row_align) and (batch >= 2 * k_unit)
    if (need_lane_split or want_lane_steps) and batch > k_unit:
        k = max(k_unit, ((batch // 2) // k_unit) * k_unit)
        while k > k_unit and not fits(min_rows, k):
            k = max(k_unit, ((k // 2) // k_unit) * k_unit)
    tile_l = lanes if k >= batch else k * d_model      # full lanes, or a 128-aligned multiple of d_model
    lane_steps = pl.cdiv(lanes, tile_l)

    # ---- seq tiling (sublane-aligned, and >= 2 total grid steps whenever possible)
    max_rows = max(1, budget // (2 * itemsize * (3 * tile_l + d_model)))
    if seq <= row_align:
        tile_s = seq                                   # full second-minor dim: exempt from the 8-row rule
    else:
        tile_s = min(seq, max(row_align, (max_rows // row_align) * row_align))
        if lane_steps == 1 and tile_s >= seq and seq >= 2 * row_align:
            half = pl.cdiv(seq, 2)
            tile_s = max(row_align, pl.cdiv(half, row_align) * row_align)
    seq_steps = pl.cdiv(seq, tile_s)

    reps = tile_l // d_model                            # batch members covered by one lane tile
    x2 = x.reshape(seq, lanes)                          # contiguous reshape: free
    fe2 = fe.reshape(seq, lanes)
    pe2 = pe_slice.reshape(seq, d_model)                # pe stays un-broadcast in HBM

    out2 = pl.pallas_call(
        _make_add2d_kernel(reps),
        out_shape=jax.ShapeDtypeStruct((seq, lanes), x.dtype),
        grid_spec=pltpu.PrefetchScalarGridSpec(
            num_scalar_prefetch=0,
            grid=(seq_steps, lane_steps),
            in_specs=[
                pl.BlockSpec((tile_s, tile_l), lambda i, j: (i, j)),
                pl.BlockSpec((tile_s, d_model), lambda i, j: (i, 0)),
                pl.BlockSpec((tile_s, tile_l), lambda i, j: (i, j)),
            ],
            out_specs=pl.BlockSpec((tile_s, tile_l), lambda i, j: (i, j)),
        ),
        compiler_params=pltpu.CompilerParams(
            dimension_semantics=("parallel", "parallel"),
            vmem_limit_bytes=limit,
        ),
    )(x2, pe2, fe2)
    return out2.reshape(seq, batch, d_model)


# ----------------------------------------------------------------------------- wrapper
def positional_encoding_forward(x: jnp.ndarray, fe: jnp.ndarray, pe: jnp.ndarray) -> jnp.ndarray:
    """x, fe: (seq, batch, d_model); pe: (max_len, 1, d_model). Returns x + pe[:seq] + fe."""
    seq, batch, d_model = x.shape
    assert fe.shape == x.shape
    # pe is cast to x.dtype (for f32 activations this matches PyTorch exactly; for bf16/fp8
    # PyTorch would promote to f32 instead -- documented, accepted difference).
    pe_slice = pe[:seq].astype(x.dtype)                 # (seq, 1, d_model)

    itemsize = jnp.dtype(x.dtype).itemsize
    row_align = (8 * 4) // itemsize                     # sublane packing for this dtype
    budget, limit = _vmem_budget_and_limit()

    # 3-D path only when it is actually dense: lane dim a multiple of 128 AND the batch
    # (sublane) dim packed for this dtype.  Otherwise flatten (e.g. batch=2 would pad 2->8
    # sublanes: 4x wasted vregs/issue and a 4x-larger real VMEM footprint).
    if d_model % 128 == 0 and batch % row_align == 0:
        out = _forward_3d(x, fe, pe_slice, budget, limit)
        if out is not None:
            return out
    return _forward_2d(x, fe, pe_slice, budget, limit)


if __name__ == "__main__":
    key = jax.random.PRNGKey(0)
    k1, k2, k3, k4, k5, k6, k7, k8 = jax.random.split(key, 8)

    # --- case 1: module-default-like small shapes (flattened path, in-VMEM pe tile) ---
    seq_len, batch, d_model = 8, 2, 32
    pe = _build_pe(d_model, 64)
    x = jax.random.normal(k1, (seq_len, batch, d_model), dtype=jnp.float32)
    fe = jax.random.normal(k2, (seq_len, batch, d_model), dtype=jnp.float32)
    out = jax.block_until_ready(positional_encoding_forward(x, fe, pe))
    ref = x + pe[:seq_len] + fe
    assert out.shape == (seq_len, batch, d_model)
    assert jnp.allclose(out, ref, atol=1e-6), "mismatch (flattened narrow-d_model path)"

    # --- case 2: d_model % 128 == 0 but small batch -> still flattened (sublane-dense) ---
    s2, b2, d2 = 16, 2, 128
    pe2 = _build_pe(d2, 64)
    x2 = jax.random.normal(k3, (s2, b2, d2), dtype=jnp.float32)
    fe2 = jax.random.normal(k4, (s2, b2, d2), dtype=jnp.float32)
    out2 = jax.block_until_ready(positional_encoding_forward(x2, fe2, pe2))
    ref2 = x2 + pe2[:s2] + fe2
    assert jnp.allclose(out2, ref2, atol=1e-6), "mismatch (flattened, d_model=128 path)"

    # --- case 3: fully aligned (batch % 8 == 0, d_model % 128 == 0) -> 3-D path, >=2 steps ---
    s3, b3, d3 = 16, 8, 128
    pe3 = _build_pe(d3, 64)
    x3 = jax.random.normal(k5, (s3, b3, d3), dtype=jnp.float32)
    fe3 = jax.random.normal(k6, (s3, b3, d3), dtype=jnp.float32)
    out3 = jax.block_until_ready(positional_encoding_forward(x3, fe3, pe3))
    ref3 = x3 + pe3[:s3] + fe3
    assert jnp.allclose(out3, ref3, atol=1e-6), "mismatch (3-D aligned path)"

    # --- case 4: bf16 (dtype-aware sublane rounding: 16-row granule) ---
    s4, b4, d4 = 32, 2, 32
    pe4 = _build_pe(d4, 64)
    x4 = jax.random.normal(k7, (s4, b4, d4), dtype=jnp.float32).astype(jnp.bfloat16)
    fe4 = jax.random.normal(k8, (s4, b4, d4), dtype=jnp.float32).astype(jnp.bfloat16)
    out4 = jax.block_until_ready(positional_encoding_forward(x4, fe4, pe4))
    ref4 = x4 + pe4[:s4].astype(jnp.bfloat16) + fe4
    assert jnp.allclose(out4.astype(jnp.float32), ref4.astype(jnp.float32),
                        atol=2e-2, rtol=2e-2), "mismatch (bf16 path)"

    print("KERNEL_OK")
</pallas_src>

<mosaic_0001>
module attributes {stable_mosaic.version = 11 : i64} {
  func.func @kernel(%arg0: i32, %arg1: i32, %arg2: memref<8x64xf32, #tpu.memory_space<vmem>>, %arg3: memref<8x32xf32, #tpu.memory_space<vmem>>, %arg4: memref<8x64xf32, #tpu.memory_space<vmem>>, %arg5: memref<8x64xf32, #tpu.memory_space<vmem>>) attributes {dimension_semantics = [#tpu.dimension_semantics<parallel>, #tpu.dimension_semantics<parallel>], iteration_bounds = array<i64: 1, 1>, scalar_prefetch = 0 : i64, scratch_operands = 0 : i64, tpu.core_type = #tpu.core_type<tc>, window_params = [{transform_indices = @transform_0, window_bounds = array<i64: 8, 64>}, {transform_indices = @transform_1, window_bounds = array<i64: 8, 32>}, {transform_indices = @transform_2, window_bounds = array<i64: 8, 64>}, {transform_indices = @transform_3, window_bounds = array<i64: 8, 64>}]} {
    %c0 = arith.constant 0 : index
    %c0_0 = arith.constant 0 : index
    %0 = vector.load %arg3[%c0, %c0_0] : memref<8x32xf32, #tpu.memory_space<vmem>>, vector<8x32xf32>
    %1 = tpu.concatenate %0, %0 in 1 : vector<8x32xf32>, vector<8x32xf32> -> vector<8x64xf32>
    %c0_1 = arith.constant 0 : index
    %c0_2 = arith.constant 0 : index
    %2 = vector.load %arg2[%c0_1, %c0_2] : memref<8x64xf32, #tpu.memory_space<vmem>>, vector<8x64xf32>
    %3 = arith.addf %2, %1 : vector<8x64xf32>
    %c0_3 = arith.constant 0 : index
    %c0_4 = arith.constant 0 : index
    %4 = vector.load %arg4[%c0_3, %c0_4] : memref<8x64xf32, #tpu.memory_space<vmem>>, vector<8x64xf32>
    %5 = arith.addf %3, %4 : vector<8x64xf32>
    %c0_5 = arith.constant 0 : index
    %c0_6 = arith.constant 0 : index
    %6 = vector.load %arg5[%c0_5, %c0_6] : memref<8x64xf32, #tpu.memory_space<vmem>>, vector<8x64xf32>
    tpu.vector_store %arg5[%c0_5, %c0_6], %5 {strides = array<i32>} : memref<8x64xf32, #tpu.memory_space<vmem>>, vector<8x64xf32>,
    return
  }
  func.func @transform_0(%arg0: i32, %arg1: i32) -> (i32, i32) {
    %c0_i32 = arith.constant 0 : i32
    return %arg0, %arg1 : i32, i32
  }
  func.func @transform_1(%arg0: i32, %arg1: i32) -> (i32, i32) {
    %c0_i32 = arith.constant 0 : i32
    %c0_i32_0 = arith.constant 0 : i32
    return %arg0, %c0_i32 : i32, i32
  }
  func.func @transform_2(%arg0: i32, %arg1: i32) -> (i32, i32) {
    %c0_i32 = arith.constant 0 : i32
    return %arg0, %arg1 : i32, i32
  }
  func.func @transform_3(%arg0: i32, %arg1: i32) -> (i32, i32) {
    %c0_i32 = arith.constant 0 : i32
    return %arg0, %arg1 : i32, i32
  }
}

</mosaic_0001>

<bundles_post_ra>
// kernel: tpu_custom_call.1
= control target key start
LH: loop header
LB: loop body
LE: loop exit
PB: predicated region body
PF: predicated region fallthrough
CT: control target
= control target key end

     0   :  { %8 = vsyncpa [#allocation3], 0  ;;  %s251_s0 = inlined_call_operand.hbm [shape: f32[8,64], index: 0, kind: input, shape index: {}]   ;;  %s252_s1 = inlined_call_operand.hbm [shape: f32[8,32], index: 1, kind: input, shape index: {}]   ;;  %s253_s2 = inlined_call_operand.hbm [shape: f32[8,64], index: 2, kind: input, shape index: {}]   ;;  %s254_s3 = inlined_call_operand.hbm [shape: f32[8,64], index: 3, kind: output, shape index: {}]  }
   0x1   :  { %9 = vsyncpa [#allocation6], 0 }
   0x2   :  { %10 = vsyncpa [#allocation4], 0  ;;  %s178_s12 = smov [#allocation5]   ;;  %s179_s14 = smov [#allocation2]  }
   0x3   :  { %s27_s13 = sshll.u32 %s178_s12, 4  ;;  %s17_s15 = sshll.u32 %s179_s14, 4  ;;  %s28_s13 = int_to_ptr.vmem [resolvable:$true] %s27_s13  ;;  %s18_s15 = int_to_ptr.vmem [resolvable:$true] %s17_s15 }
   0x4   :  { %s84_s18 = scalar_lea.hbm %s252_s1, 128 }
   0x5   :  { %p85_p0 = scmp.ne.s32.totalorder %s252_s1, %s84_s18  ;;  %p88_p1 = scmp.lt.u32.totalorder %s84_s18, %s252_s1 }
   0x7   :  { %p90_p2 = pnand %p88_p1, %p85_p0 }
   0x9   :  { %93 = shalt.err (!%p90_p2)
}
   0xa   :  { %s94_s23 = scalar_lea.vmem %s28_s13, 128  ;;  %p99_p4 = scmp.lt.s32.totalorder %s28_s13, %s28_s13 }
   0xb   :  { %p95_p3 = scmp.ne.s32.totalorder %s28_s13, %s94_s23  ;;  %p100_p5 = scmp.lt.s32.totalorder %s94_s23, %s94_s23 }
   0xd   :  { %p101_p6 = por %p100_p5, %p99_p4 }
   0xf   :  { %p102_p7 = pnand %p101_p6, %p95_p3 }
  0x11   :  { %105 = shalt.err (!%p102_p7)
}
  0x12   :  { %30 = dma.hbm_to_vmem [thread:$0]  %s252_s1, 128, %s28_s13, [#allocation6]  }
  0x13   :  { %s106_s28 = scalar_lea.hbm %s251_s0, 128 }
  0x14   :  { %p107_p8 = scmp.ne.s32.totalorder %s251_s0, %s106_s28  ;;  %p110_p9 = scmp.lt.u32.totalorder %s106_s28, %s251_s0 }
  0x16   :  { %p112_p10 = pnand %p110_p9, %p107_p8 }
  0x18   :  { %115 = shalt.err (!%p112_p10)
}
  0x19   :  { %s116_s6 = scalar_lea.vmem %s18_s15, 128  ;;  %p121_p12 = scmp.lt.s32.totalorder %s18_s15, %s18_s15 }
  0x1a   :  { %p117_p11 = scmp.ne.s32.totalorder %s18_s15, %s116_s6  ;;  %p122_p13 = scmp.lt.s32.totalorder %s116_s6, %s116_s6 }
  0x1c   :  { %p123_p0 = por %p122_p13, %p121_p12 }
  0x1e   :  { %p124_p1 = pnand %p123_p0, %p117_p11 }
  0x20   :  { %127 = shalt.err (!%p124_p1)
}
  0x21   :  { %20 = dma.hbm_to_vmem [thread:$0]  %s251_s0, 128, %s18_s15, [#allocation3]  }
  0x22   :  { %s180_s8 = smov [#allocation7]   ;;  %s128_s12 = scalar_lea.hbm %s253_s2, 128 }
  0x23   :  { %s37_s9 = sshll.u32 %s180_s8, 4  ;;  %p129_p2 = scmp.ne.s32.totalorder %s253_s2, %s128_s12  ;;  %s38_s9 = int_to_ptr.vmem [resolvable:$true] %s37_s9 }
  0x24   :  { %p132_p3 = scmp.lt.u32.totalorder %s128_s12, %s253_s2 }
  0x26   :  { %p134_p4 = pnand %p132_p3, %p129_p2 }
  0x28   :  { %137 = shalt.err (!%p134_p4)
}
  0x29   :  { %s138_s18 = scalar_lea.vmem %s38_s9, 128  ;;  %p143_p6 = scmp.lt.s32.totalorder %s38_s9, %s38_s9 }
  0x2a   :  { %p139_p5 = scmp.ne.s32.totalorder %s38_s9, %s138_s18  ;;  %p144_p7 = scmp.lt.s32.totalorder %s138_s18, %s138_s18 }
  0x2c   :  { %p145_p8 = por %p144_p7, %p143_p6 }
  0x2e   :  { %p146_p9 = pnand %p145_p8, %p139_p5 }
  0x30   :  { %149 = shalt.err (!%p146_p9)
}
  0x31   :  { %40 = dma.hbm_to_vmem [thread:$0]  %s253_s2, 128, %s38_s9, [#allocation6]  }
  0x32   :  { %172 = dma.done.wait [#allocation3], 128  }
  0x33   :  { %173 = vsyncadd [#allocation3], 4294967168 }
  0x34   :  { %174 = dma.done.wait [#allocation6], 256  }
  0x35   :  { %175 = vsyncadd [#allocation6], 4294967040  ;;  %v50_v0 = vld [vmem:[#allocation5] sm:$0xff]  ;;  %s181_s19 = smov 32   ;;  %vm55_vm0 = vcmask 261120   ;;  %v57_v1 = vld [vmem:[#allocation2] sm:$0xff] }
  0x36   :  { %52 = vrot.lane.b32.xlu0 %v50_v0, %s181_s19  ;;  %v59_v4 = vld [vmem:[#allocation7] sm:$0xff]  ;;  %s182_s20 = smov [#allocation8]   ;;  %vm61_vm1 = vcmask 523264  }
  0x37   :  { %s69_s21 = sshll.u32 %s182_s20, 4  ;;  %s70_s21 = int_to_ptr.vmem [resolvable:$true] %s69_s21 }
  0x38   :  { %s150_s2 = scalar_lea.vmem %s70_s21, 128  ;;  %p155_p11 = scmp.lt.s32.totalorder %s70_s21, %s70_s21 }
  0x39   :  { %p151_p10 = scmp.ne.s32.totalorder %s70_s21, %s150_s2  ;;  %p156_p12 = scmp.lt.s32.totalorder %s150_s2, %s150_s2 }
  0x3b   :  { %p157_p13 = por %p156_p12, %p155_p11 }
  0x3d   :  { %p158_p0 = pnand %p157_p13, %p151_p10 }
  0xa8   :  { %v53_v2 = vpop.permute.xlu0 %52 }
  0xa9   :  { %v56_v3 = vsel %vm55_vm0, %v50_v0, %v53_v2 }
  0xaa   :  { %v58_v5 = vadd.f32 %v57_v1, %v56_v3 }
  0xac   :  { %v60_v6 = vadd.f32 %v59_v4, %v58_v5 }
  0xae   :  { %62 = vst.msk [vmem:[#allocation8] sm:$0xff] %vm61_vm1, %v60_v6 }
  0xaf   :  { %161 = shalt.err (!%p158_p0)
}
  0xb0   :  { %s162_s24 = scalar_lea.hbm %s254_s3, 128 }
  0xb1   :  { %p163_p1 = scmp.ne.s32.totalorder %s254_s3, %s162_s24  ;;  %p166_p2 = scmp.lt.u32.totalorder %s162_s24, %s254_s3 }
  0xb3   :  { %p168_p3 = pnand %p166_p2, %p163_p1 }
  0xb5   :  { %171 = shalt.err (!%p168_p3)
}
  0xb6   :  { %72 = dma.vmem_to_hbm [thread:$0]  %s70_s21, 128, %s254_s3, [#allocation4]  }
  0xb7   :  { %176 = dma.done.wait [#allocation4], 128  }
  0xb8   :  { %177 = vsyncadd [#allocation4], 4294967168 }
  0xb9   :  { %76 = vsyncpa [#allocation3], 1 }
  0xba   :  { %77 = vsyncpa [#allocation6], 1 }
  0xbb   :  { %78 = vsyncpa [#allocation4], 1 }

</bundles_post_ra>
